<compile_context>
chip_gen: v7x
topology: tpu7x:2x2x1
jax: 0.10.0
libtpu: 0.0.40
codegen_flags: <defaults>
</compile_context>

<pallas_src>
import jax
import jax.numpy as jnp
from jax import lax
from jax.experimental import pallas as pl
from jax.experimental.pallas import tpu as pltpu


def _fold_bn(gamma, beta, mean, var, eps):
    """Fold eval-mode BatchNorm into a per-channel scale / shift (f32)."""
    inv = gamma.astype(jnp.float32) / jnp.sqrt(var.astype(jnp.float32) + eps)
    return inv, beta.astype(jnp.float32) - mean.astype(jnp.float32) * inv


def _fold_conv_weight(w_hwio):
    """(3, 3, Cin, Cout) HWIO -> (3, Cout, 3*Cin) bf16, last axis ordered (dw, c_in)."""
    kh, kw, cin, cout = w_hwio.shape
    w = jnp.transpose(w_hwio, (0, 3, 1, 2)).reshape(kh, cout, kw * cin)
    return w.astype(jnp.bfloat16)


def residual_block(x_nchw, w1, gamma1, beta1, mean1, var1,
                   w2, gamma2, beta2, mean2, var2, eps=1e-5):
    x = x_nchw.astype(jnp.float32)
    N, C, H, W = x.shape
    assert H >= 2 and W >= 2, "ReflectionPad2d(1) needs H, W >= 2"
    P = W + 2                  # lane stride of one padded image row
    HP = H * P                 # flattened extent of the H output rows (lane-dense)
    L = (H + 2) * P + 2        # flattened padded image (+2 tail lanes so the dh=2, dw=2
                               # tap slice stays in bounds; tail feeds only don't-care cols)

    def kernel(xpad_ref, col_ref, w1_ref, s1_ref, b1_ref,
               w2_ref, s2_ref, b2_ref, out_ref, yp_ref):
        xp = xpad_ref[0]                               # (C, L) f32, flat padded input
        col = col_ref[...]                             # (1, HP) int32, lane index % P

        def conv3x3(src, w_ref):
            # src:   (C, L) flattened padded source (row stride P)
            # w_ref: (3, C_out, 3*C_in) bf16 -- the 3 horizontal taps folded into K.
            # Returns (C_out, HP) f32; columns W, W+1 of each row are don't-care.
            acc = jnp.zeros((C, HP), jnp.float32)
            for dh in range(3):
                patch = jnp.concatenate(
                    [src[:, dh * P + dw: dh * P + dw + HP] for dw in range(3)],
                    axis=0).astype(jnp.bfloat16)       # (3*C_in, HP), lane-dense
                acc = acc + jnp.dot(w_ref[dh], patch,
                                    preferred_element_type=jnp.float32)
            return acc

        # conv1 -> folded BN1 -> ReLU.
        # TODO(synk): nn.Dropout(0.5) training-mode random masking not reproduced
        # (eval-mode identity used here).
        y = conv3x3(xp, w1_ref)
        y = jnp.maximum(y * s1_ref[...] + b1_ref[...], 0.0)        # (C, HP)

        # ReflectionPad2d(1) of the intermediate, in flat layout, via scratch slice-writes.
        # B[:, h*P + c] holds padded row h+1 at padded column c (only valid y columns used).
        prev1 = jnp.concatenate([y[:, :1], y[:, :-1]], axis=1)     # y[h, c-1] (interior)
        next1 = jnp.concatenate([y[:, 1:], y[:, -1:]], axis=1)     # y[h, 1]   (left pad)
        prev3 = jnp.concatenate([y[:, :3], y[:, :-3]], axis=1)     # y[h, W-2] (right pad)
        B = jnp.where(col == 0, next1,
                      jnp.where(col == P - 1, prev3, prev1))       # (C, HP)
        yp_ref[:, 0:P] = B[:, P:2 * P]                             # top row = padded row 2
        yp_ref[:, P:P + HP] = B                                    # interior rows
        yp_ref[:, (H + 1) * P:(H + 2) * P] = B[:, (H - 2) * P:(H - 1) * P]   # bottom row
        yp_ref[:, (H + 2) * P:] = jnp.zeros((C, 2), jnp.float32)   # unused tail lanes

        # conv2 -> folded BN2 -> residual add (residual = interior of the padded input,
        # so no duplicate unpadded-input stream is needed).
        r = conv3x3(yp_ref[...], w2_ref)
        r = r * s2_ref[...] + b2_ref[...]
        out_ref[0] = xp[:, P + 1:P + 1 + HP] + r

    # Host-side prep (no transposes; pad + free reshapes only).
    xpad = jnp.pad(x, ((0, 0), (0, 0), (1, 1), (1, 1)), mode="reflect")
    xpad_flat = jnp.pad(xpad.reshape(N, C, (H + 2) * P), ((0, 0), (0, 0), (0, 2)))
    col = (jnp.arange(HP, dtype=jnp.int32) % P).reshape(1, HP)

    s1, b1 = _fold_bn(gamma1, beta1, mean1, var1, eps)
    s2, b2 = _fold_bn(gamma2, beta2, mean2, var2, eps)
    s1, b1, s2, b2 = (v.reshape(C, 1) for v in (s1, b1, s2, b2))
    w1d = _fold_conv_weight(w1)
    w2d = _fold_conv_weight(w2)

    out_flat = pl.pallas_call(
        kernel,
        out_shape=jax.ShapeDtypeStruct((N, C, HP), jnp.float32),
        grid_spec=pltpu.PrefetchScalarGridSpec(
            num_scalar_prefetch=0,
            grid=(N,),
            in_specs=[
                pl.BlockSpec((1, C, L), lambda n: (n, 0, 0)),        # padded input (flat)
                pl.BlockSpec((1, HP), lambda n: (0, 0)),             # lane % P (resident)
                pl.BlockSpec((3, C, 3 * C), lambda n: (0, 0, 0)),    # w1 (resident)
                pl.BlockSpec((C, 1), lambda n: (0, 0)),              # bn1 scale
                pl.BlockSpec((C, 1), lambda n: (0, 0)),              # bn1 shift
                pl.BlockSpec((3, C, 3 * C), lambda n: (0, 0, 0)),    # w2 (resident)
                pl.BlockSpec((C, 1), lambda n: (0, 0)),              # bn2 scale
                pl.BlockSpec((C, 1), lambda n: (0, 0)),              # bn2 shift
            ],
            out_specs=pl.BlockSpec((1, C, HP), lambda n: (n, 0, 0)),
            scratch_shapes=[pltpu.VMEM((C, L), jnp.float32)],        # padded intermediate
        ),
        compiler_params=pltpu.CompilerParams(
            dimension_semantics=("parallel",),     # batch steps can split across v7x TCs
            vmem_limit_bytes=32 * 1024 * 1024,
        ),
    )(xpad_flat, col, w1d, s1, b1, w2d, s2, b2)

    # Drop the 2 don't-care columns per row: (N, C, H*P) -> (N, C, H, W).
    return out_flat.reshape(N, C, H, P)[:, :, :, :W]


def residual_block_ref(x_nchw, w1, gamma1, beta1, mean1, var1,
                       w2, gamma2, beta2, mean2, var2, eps=1e-5):
    # Pure-JAX reference (eval-mode semantics) computed at the kernel's matmul precision
    # (bf16 operands, f32 accumulation), so the comparison isolates structural errors.
    dn = ("NCHW", "HWIO", "NCHW")
    x = x_nchw.astype(jnp.float32)
    s1, b1 = _fold_bn(gamma1, beta1, mean1, var1, eps)
    s2, b2 = _fold_bn(gamma2, beta2, mean2, var2, eps)
    xp = jnp.pad(x, ((0, 0), (0, 0), (1, 1), (1, 1)), mode="reflect")
    y = lax.conv_general_dilated(xp.astype(jnp.bfloat16), w1.astype(jnp.bfloat16),
                                 (1, 1), "VALID", dimension_numbers=dn,
                                 preferred_element_type=jnp.float32)
    y = jnp.maximum(y * s1[None, :, None, None] + b1[None, :, None, None], 0.0)
    yp = jnp.pad(y, ((0, 0), (0, 0), (1, 1), (1, 1)), mode="reflect")
    r = lax.conv_general_dilated(yp.astype(jnp.bfloat16), w2.astype(jnp.bfloat16),
                                 (1, 1), "VALID", dimension_numbers=dn,
                                 preferred_element_type=jnp.float32)
    r = r * s2[None, :, None, None] + b2[None, :, None, None]
    return x + r


if __name__ == "__main__":
    N, C, H, W = 2, 4, 16, 16
    key = jax.random.PRNGKey(0)
    ks = jax.random.split(key, 11)

    x = jax.random.normal(ks[0], (N, C, H, W), jnp.float32)

    # Conv weights in HWIO (kh, kw, c_in, c_out), no bias (matches Conv2d bias=False).
    w1 = 0.1 * jax.random.normal(ks[1], (3, 3, C, C), jnp.float32)
    w2 = 0.1 * jax.random.normal(ks[2], (3, 3, C, C), jnp.float32)

    # BatchNorm parameters / running stats (deterministic, eval mode).
    gamma1 = 1.0 + 0.1 * jax.random.normal(ks[3], (C,), jnp.float32)
    beta1 = 0.1 * jax.random.normal(ks[4], (C,), jnp.float32)
    mean1 = 0.1 * jax.random.normal(ks[5], (C,), jnp.float32)
    var1 = 0.5 + jnp.abs(jax.random.normal(ks[6], (C,), jnp.float32))
    gamma2 = 1.0 + 0.1 * jax.random.normal(ks[7], (C,), jnp.float32)
    beta2 = 0.1 * jax.random.normal(ks[8], (C,), jnp.float32)
    mean2 = 0.1 * jax.random.normal(ks[9], (C,), jnp.float32)
    var2 = 0.5 + jnp.abs(jax.random.normal(ks[10], (C,), jnp.float32))

    out = residual_block(x, w1, gamma1, beta1, mean1, var1,
                         w2, gamma2, beta2, mean2, var2)
    out = jax.block_until_ready(out)

    ref = residual_block_ref(x, w1, gamma1, beta1, mean1, var1,
                             w2, gamma2, beta2, mean2, var2)
    assert out.shape == (N, C, H, W)
    assert jnp.allclose(out, ref, atol=5e-3, rtol=5e-3), "mismatch vs reference"

    print("KERNEL_OK")
</pallas_src>

<mosaic_0001>
module attributes {stable_mosaic.version = 11 : i64} {
  func.func @kernel(%arg0: i32, %arg1: memref<1x4x326xf32, #tpu.memory_space<vmem>>, %arg2: memref<1x288xi32, #tpu.memory_space<vmem>>, %arg3: memref<3x4x12xbf16, #tpu.memory_space<vmem>>, %arg4: memref<4x1xf32, #tpu.memory_space<vmem>>, %arg5: memref<4x1xf32, #tpu.memory_space<vmem>>, %arg6: memref<3x4x12xbf16, #tpu.memory_space<vmem>>, %arg7: memref<4x1xf32, #tpu.memory_space<vmem>>, %arg8: memref<4x1xf32, #tpu.memory_space<vmem>>, %arg9: memref<1x4x288xf32, #tpu.memory_space<vmem>>, %arg10: memref<4x326xf32, #tpu.memory_space<vmem>>) attributes {dimension_semantics = [#tpu.dimension_semantics<parallel>], iteration_bounds = array<i64: 2>, scalar_prefetch = 0 : i64, scratch_operands = 1 : i64, tpu.core_type = #tpu.core_type<tc>, window_params = [{transform_indices = @transform_0, window_bounds = array<i64: 1, 4, 326>}, {pipeline_mode = #tpu.pipeline_mode<synchronous>, transform_indices = @transform_1, window_bounds = array<i64: 1, 288>}, {pipeline_mode = #tpu.pipeline_mode<synchronous>, transform_indices = @transform_2, window_bounds = array<i64: 3, 4, 12>}, {pipeline_mode = #tpu.pipeline_mode<synchronous>, transform_indices = @transform_3, window_bounds = array<i64: 4, 1>}, {pipeline_mode = #tpu.pipeline_mode<synchronous>, transform_indices = @transform_4, window_bounds = array<i64: 4, 1>}, {pipeline_mode = #tpu.pipeline_mode<synchronous>, transform_indices = @transform_5, window_bounds = array<i64: 3, 4, 12>}, {pipeline_mode = #tpu.pipeline_mode<synchronous>, transform_indices = @transform_6, window_bounds = array<i64: 4, 1>}, {pipeline_mode = #tpu.pipeline_mode<synchronous>, transform_indices = @transform_7, window_bounds = array<i64: 4, 1>}, {transform_indices = @transform_8, window_bounds = array<i64: 1, 4, 288>}]} {
    %c0 = arith.constant 0 : index
    %c0_0 = arith.constant 0 : index
    %c0_1 = arith.constant 0 : index
    %0 = vector.load %arg1[%c0, %c0_0, %c0_1] : memref<1x4x326xf32, #tpu.memory_space<vmem>>, vector<1x4x326xf32>
    %1 = vector.shape_cast %0 : vector<1x4x326xf32> to vector<4x326xf32>
    %c0_2 = arith.constant 0 : index
    %c0_3 = arith.constant 0 : index
    %2 = vector.load %arg2[%c0_2, %c0_3] : memref<1x288xi32, #tpu.memory_space<vmem>>, vector<1x288xi32>
    %cst = arith.constant 0.000000e+00 : f32
    %3 = vector.broadcast %cst : f32 to vector<4x288xf32>
    %4 = vector.extract_strided_slice %1 {offsets = [0, 0], sizes = [4, 288], strides = [1, 1]} : vector<4x326xf32> to vector<4x288xf32>
    %5 = vector.extract_strided_slice %1 {offsets = [0, 1], sizes = [4, 288], strides = [1, 1]} : vector<4x326xf32> to vector<4x288xf32>
    %6 = vector.extract_strided_slice %1 {offsets = [0, 2], sizes = [4, 288], strides = [1, 1]} : vector<4x326xf32> to vector<4x288xf32>
    %7 = tpu.concatenate %4, %5, %6 in 0 : vector<4x288xf32>, vector<4x288xf32>, vector<4x288xf32> -> vector<12x288xf32>
    %8 = arith.truncf %7 : vector<12x288xf32> to vector<12x288xbf16>
    %c0_4 = arith.constant 0 : index
    %c0_5 = arith.constant 0 : index
    %c0_6 = arith.constant 0 : index
    %9 = vector.load %arg3[%c0_4, %c0_5, %c0_6] : memref<3x4x12xbf16, #tpu.memory_space<vmem>>, vector<1x4x12xbf16>
    %10 = vector.shape_cast %9 : vector<1x4x12xbf16> to vector<4x12xbf16>
    %cst_7 = arith.constant dense<0.000000e+00> : vector<4x288xf32>
    %11 = tpu.matmul %10, %8, %cst_7 {dimension_numbers = #tpu.dot_dimension_numbers<[1], [0], [0], [1], [0, 0, 1, 1], [], []>} : vector<4x12xbf16>, vector<12x288xbf16>, vector<4x288xf32> -> vector<4x288xf32>
    %12 = arith.addf %3, %11 : vector<4x288xf32>
    %13 = vector.extract_strided_slice %1 {offsets = [0, 18], sizes = [4, 288], strides = [1, 1]} : vector<4x326xf32> to vector<4x288xf32>
    %14 = vector.extract_strided_slice %1 {offsets = [0, 19], sizes = [4, 288], strides = [1, 1]} : vector<4x326xf32> to vector<4x288xf32>
    %15 = vector.extract_strided_slice %1 {offsets = [0, 20], sizes = [4, 288], strides = [1, 1]} : vector<4x326xf32> to vector<4x288xf32>
    %16 = tpu.concatenate %13, %14, %15 in 0 : vector<4x288xf32>, vector<4x288xf32>, vector<4x288xf32> -> vector<12x288xf32>
    %17 = arith.truncf %16 : vector<12x288xf32> to vector<12x288xbf16>
    %c1 = arith.constant 1 : index
    %c0_8 = arith.constant 0 : index
    %c0_9 = arith.constant 0 : index
    %18 = vector.load %arg3[%c1, %c0_8, %c0_9] : memref<3x4x12xbf16, #tpu.memory_space<vmem>>, vector<1x4x12xbf16>
    %19 = vector.shape_cast %18 : vector<1x4x12xbf16> to vector<4x12xbf16>
    %cst_10 = arith.constant dense<0.000000e+00> : vector<4x288xf32>
    %20 = tpu.matmul %19, %17, %cst_10 {dimension_numbers = #tpu.dot_dimension_numbers<[1], [0], [0], [1], [0, 0, 1, 1], [], []>} : vector<4x12xbf16>, vector<12x288xbf16>, vector<4x288xf32> -> vector<4x288xf32>
    %21 = arith.addf %12, %20 : vector<4x288xf32>
    %22 = vector.extract_strided_slice %1 {offsets = [0, 36], sizes = [4, 288], strides = [1, 1]} : vector<4x326xf32> to vector<4x288xf32>
    %23 = vector.extract_strided_slice %1 {offsets = [0, 37], sizes = [4, 288], strides = [1, 1]} : vector<4x326xf32> to vector<4x288xf32>
    %24 = vector.extract_strided_slice %1 {offsets = [0, 38], sizes = [4, 288], strides = [1, 1]} : vector<4x326xf32> to vector<4x288xf32>
    %25 = tpu.concatenate %22, %23, %24 in 0 : vector<4x288xf32>, vector<4x288xf32>, vector<4x288xf32> -> vector<12x288xf32>
    %26 = arith.truncf %25 : vector<12x288xf32> to vector<12x288xbf16>
    %c2 = arith.constant 2 : index
    %c0_11 = arith.constant 0 : index
    %c0_12 = arith.constant 0 : index
    %27 = vector.load %arg3[%c2, %c0_11, %c0_12] : memref<3x4x12xbf16, #tpu.memory_space<vmem>>, vector<1x4x12xbf16>
    %28 = vector.shape_cast %27 : vector<1x4x12xbf16> to vector<4x12xbf16>
    %cst_13 = arith.constant dense<0.000000e+00> : vector<4x288xf32>
    %29 = tpu.matmul %28, %26, %cst_13 {dimension_numbers = #tpu.dot_dimension_numbers<[1], [0], [0], [1], [0, 0, 1, 1], [], []>} : vector<4x12xbf16>, vector<12x288xbf16>, vector<4x288xf32> -> vector<4x288xf32>
    %30 = arith.addf %21, %29 : vector<4x288xf32>
    %c0_14 = arith.constant 0 : index
    %c0_15 = arith.constant 0 : index
    %31 = vector.load %arg4[%c0_14, %c0_15] : memref<4x1xf32, #tpu.memory_space<vmem>>, vector<4x1xf32>
    %32 = vector.broadcast %31 : vector<4x1xf32> to vector<4x288xf32>
    %33 = arith.mulf %30, %32 : vector<4x288xf32>
    %c0_16 = arith.constant 0 : index
    %c0_17 = arith.constant 0 : index
    %34 = vector.load %arg5[%c0_16, %c0_17] : memref<4x1xf32, #tpu.memory_space<vmem>>, vector<4x1xf32>
    %35 = vector.broadcast %34 : vector<4x1xf32> to vector<4x288xf32>
    %36 = arith.addf %33, %35 : vector<4x288xf32>
    %cst_18 = arith.constant 0.000000e+00 : f32
    %37 = vector.broadcast %cst_18 : f32 to vector<4x288xf32>
    %38 = arith.maximumf %36, %37 : vector<4x288xf32>
    %39 = vector.extract_strided_slice %38 {offsets = [0, 0], sizes = [4, 1], strides = [1, 1]} : vector<4x288xf32> to vector<4x1xf32>
    %40 = vector.extract_strided_slice %38 {offsets = [0, 0], sizes = [4, 287], strides = [1, 1]} : vector<4x288xf32> to vector<4x287xf32>
    %41 = tpu.concatenate %39, %40 in 1 : vector<4x1xf32>, vector<4x287xf32> -> vector<4x288xf32>
    %42 = vector.extract_strided_slice %38 {offsets = [0, 1], sizes = [4, 287], strides = [1, 1]} : vector<4x288xf32> to vector<4x287xf32>
    %43 = vector.extract_strided_slice %38 {offsets = [0, 287], sizes = [4, 1], strides = [1, 1]} : vector<4x288xf32> to vector<4x1xf32>
    %44 = tpu.concatenate %42, %43 in 1 : vector<4x287xf32>, vector<4x1xf32> -> vector<4x288xf32>
    %45 = vector.extract_strided_slice %38 {offsets = [0, 0], sizes = [4, 3], strides = [1, 1]} : vector<4x288xf32> to vector<4x3xf32>
    %46 = vector.extract_strided_slice %38 {offsets = [0, 0], sizes = [4, 285], strides = [1, 1]} : vector<4x288xf32> to vector<4x285xf32>
    %47 = tpu.concatenate %45, %46 in 1 : vector<4x3xf32>, vector<4x285xf32> -> vector<4x288xf32>
    %c0_i32 = arith.constant 0 : i32
    %48 = vector.broadcast %c0_i32 : i32 to vector<1x288xi32>
    %49 = arith.cmpi eq, %2, %48 : vector<1x288xi32>
    %c17_i32 = arith.constant 17 : i32
    %50 = vector.broadcast %c17_i32 : i32 to vector<1x288xi32>
    %51 = arith.cmpi eq, %2, %50 : vector<1x288xi32>
    %52 = vector.shape_cast %51 : vector<1x288xi1> to vector<1x288xi1>
    %53 = vector.broadcast %52 : vector<1x288xi1> to vector<4x288xi1>
    %54 = arith.select %53, %47, %41 : vector<4x288xi1>, vector<4x288xf32>
    %55 = vector.shape_cast %49 : vector<1x288xi1> to vector<1x288xi1>
    %56 = vector.broadcast %55 : vector<1x288xi1> to vector<4x288xi1>
    %57 = arith.select %56, %44, %54 : vector<4x288xi1>, vector<4x288xf32>
    %58 = vector.extract_strided_slice %57 {offsets = [0, 18], sizes = [4, 18], strides = [1, 1]} : vector<4x288xf32> to vector<4x18xf32>
    %c0_19 = arith.constant 0 : index
    %c0_20 = arith.constant 0 : index
    %59 = vector.load %arg10[%c0_19, %c0_20] : memref<4x326xf32, #tpu.memory_space<vmem>>, vector<4x18xf32>
    tpu.vector_store %arg10[%c0_19, %c0_20], %58 {strides = array<i32>} : memref<4x326xf32, #tpu.memory_space<vmem>>, vector<4x18xf32>,
    %c0_21 = arith.constant 0 : index
    %c18 = arith.constant 18 : index
    %60 = vector.load %arg10[%c0_21, %c18] : memref<4x326xf32, #tpu.memory_space<vmem>>, vector<4x288xf32>
    tpu.vector_store %arg10[%c0_21, %c18], %57 {strides = array<i32>} : memref<4x326xf32, #tpu.memory_space<vmem>>, vector<4x288xf32>,
    %61 = vector.extract_strided_slice %57 {offsets = [0, 252], sizes = [4, 18], strides = [1, 1]} : vector<4x288xf32> to vector<4x18xf32>
    %c0_22 = arith.constant 0 : index
    %c306 = arith.constant 306 : index
    %62 = vector.load %arg10[%c0_22, %c306] : memref<4x326xf32, #tpu.memory_space<vmem>>, vector<4x18xf32>
    tpu.vector_store %arg10[%c0_22, %c306], %61 {strides = array<i32>} : memref<4x326xf32, #tpu.memory_space<vmem>>, vector<4x18xf32>,
    %cst_23 = arith.constant 0.000000e+00 : f32
    %63 = vector.broadcast %cst_23 : f32 to vector<4x2xf32>
    %c0_24 = arith.constant 0 : index
    %c324 = arith.constant 324 : index
    %64 = vector.load %arg10[%c0_24, %c324] : memref<4x326xf32, #tpu.memory_space<vmem>>, vector<4x2xf32>
    tpu.vector_store %arg10[%c0_24, %c324], %63 {strides = array<i32>} : memref<4x326xf32, #tpu.memory_space<vmem>>, vector<4x2xf32>,
    %c0_25 = arith.constant 0 : index
    %c0_26 = arith.constant 0 : index
    %65 = vector.load %arg10[%c0_25, %c0_26] : memref<4x326xf32, #tpu.memory_space<vmem>>, vector<4x326xf32>
    %cst_27 = arith.constant 0.000000e+00 : f32
    %66 = vector.broadcast %cst_27 : f32 to vector<4x288xf32>
    %67 = vector.extract_strided_slice %65 {offsets = [0, 0], sizes = [4, 288], strides = [1, 1]} : vector<4x326xf32> to vector<4x288xf32>
    %68 = vector.extract_strided_slice %65 {offsets = [0, 1], sizes = [4, 288], strides = [1, 1]} : vector<4x326xf32> to vector<4x288xf32>
    %69 = vector.extract_strided_slice %65 {offsets = [0, 2], sizes = [4, 288], strides = [1, 1]} : vector<4x326xf32> to vector<4x288xf32>
    %70 = tpu.concatenate %67, %68, %69 in 0 : vector<4x288xf32>, vector<4x288xf32>, vector<4x288xf32> -> vector<12x288xf32>
    %71 = arith.truncf %70 : vector<12x288xf32> to vector<12x288xbf16>
    %c0_28 = arith.constant 0 : index
    %c0_29 = arith.constant 0 : index
    %c0_30 = arith.constant 0 : index
    %72 = vector.load %arg6[%c0_28, %c0_29, %c0_30] : memref<3x4x12xbf16, #tpu.memory_space<vmem>>, vector<1x4x12xbf16>
    %73 = vector.shape_cast %72 : vector<1x4x12xbf16> to vector<4x12xbf16>
    %cst_31 = arith.constant dense<0.000000e+00> : vector<4x288xf32>
    %74 = tpu.matmul %73, %71, %cst_31 {dimension_numbers = #tpu.dot_dimension_numbers<[1], [0], [0], [1], [0, 0, 1, 1], [], []>} : vector<4x12xbf16>, vector<12x288xbf16>, vector<4x288xf32> -> vector<4x288xf32>
    %75 = arith.addf %66, %74 : vector<4x288xf32>
    %76 = vector.extract_strided_slice %65 {offsets = [0, 18], sizes = [4, 288], strides = [1, 1]} : vector<4x326xf32> to vector<4x288xf32>
    %77 = vector.extract_strided_slice %65 {offsets = [0, 19], sizes = [4, 288], strides = [1, 1]} : vector<4x326xf32> to vector<4x288xf32>
    %78 = vector.extract_strided_slice %65 {offsets = [0, 20], sizes = [4, 288], strides = [1, 1]} : vector<4x326xf32> to vector<4x288xf32>
    %79 = tpu.concatenate %76, %77, %78 in 0 : vector<4x288xf32>, vector<4x288xf32>, vector<4x288xf32> -> vector<12x288xf32>
    %80 = arith.truncf %79 : vector<12x288xf32> to vector<12x288xbf16>
    %c1_32 = arith.constant 1 : index
    %c0_33 = arith.constant 0 : index
    %c0_34 = arith.constant 0 : index
    %81 = vector.load %arg6[%c1_32, %c0_33, %c0_34] : memref<3x4x12xbf16, #tpu.memory_space<vmem>>, vector<1x4x12xbf16>
    %82 = vector.shape_cast %81 : vector<1x4x12xbf16> to vector<4x12xbf16>
    %cst_35 = arith.constant dense<0.000000e+00> : vector<4x288xf32>
    %83 = tpu.matmul %82, %80, %cst_35 {dimension_numbers = #tpu.dot_dimension_numbers<[1], [0], [0], [1], [0, 0, 1, 1], [], []>} : vector<4x12xbf16>, vector<12x288xbf16>, vector<4x288xf32> -> vector<4x288xf32>
    %84 = arith.addf %75, %83 : vector<4x288xf32>
    %85 = vector.extract_strided_slice %65 {offsets = [0, 36], sizes = [4, 288], strides = [1, 1]} : vector<4x326xf32> to vector<4x288xf32>
    %86 = vector.extract_strided_slice %65 {offsets = [0, 37], sizes = [4, 288], strides = [1, 1]} : vector<4x326xf32> to vector<4x288xf32>
    %87 = vector.extract_strided_slice %65 {offsets = [0, 38], sizes = [4, 288], strides = [1, 1]} : vector<4x326xf32> to vector<4x288xf32>
    %88 = tpu.concatenate %85, %86, %87 in 0 : vector<4x288xf32>, vector<4x288xf32>, vector<4x288xf32> -> vector<12x288xf32>
    %89 = arith.truncf %88 : vector<12x288xf32> to vector<12x288xbf16>
    %c2_36 = arith.constant 2 : index
    %c0_37 = arith.constant 0 : index
    %c0_38 = arith.constant 0 : index
    %90 = vector.load %arg6[%c2_36, %c0_37, %c0_38] : memref<3x4x12xbf16, #tpu.memory_space<vmem>>, vector<1x4x12xbf16>
    %91 = vector.shape_cast %90 : vector<1x4x12xbf16> to vector<4x12xbf16>
    %cst_39 = arith.constant dense<0.000000e+00> : vector<4x288xf32>
    %92 = tpu.matmul %91, %89, %cst_39 {dimension_numbers = #tpu.dot_dimension_numbers<[1], [0], [0], [1], [0, 0, 1, 1], [], []>} : vector<4x12xbf16>, vector<12x288xbf16>, vector<4x288xf32> -> vector<4x288xf32>
    %93 = arith.addf %84, %92 : vector<4x288xf32>
    %c0_40 = arith.constant 0 : index
    %c0_41 = arith.constant 0 : index
    %94 = vector.load %arg7[%c0_40, %c0_41] : memref<4x1xf32, #tpu.memory_space<vmem>>, vector<4x1xf32>
    %95 = vector.broadcast %94 : vector<4x1xf32> to vector<4x288xf32>
    %96 = arith.mulf %93, %95 : vector<4x288xf32>
    %c0_42 = arith.constant 0 : index
    %c0_43 = arith.constant 0 : index
    %97 = vector.load %arg8[%c0_42, %c0_43] : memref<4x1xf32, #tpu.memory_space<vmem>>, vector<4x1xf32>
    %98 = vector.broadcast %97 : vector<4x1xf32> to vector<4x288xf32>
    %99 = arith.addf %96, %98 : vector<4x288xf32>
    %100 = vector.extract_strided_slice %1 {offsets = [0, 19], sizes = [4, 288], strides = [1, 1]} : vector<4x326xf32> to vector<4x288xf32>
    %101 = arith.addf %100, %99 : vector<4x288xf32>
    %c0_44 = arith.constant 0 : index
    %c0_45 = arith.constant 0 : index
    %c0_46 = arith.constant 0 : index
    %102 = vector.load %arg9[%c0_44, %c0_45, %c0_46] : memref<1x4x288xf32, #tpu.memory_space<vmem>>, vector<1x4x288xf32>
    %103 = vector.shape_cast %102 : vector<1x4x288xf32> to vector<4x288xf32>
    %104 = vector.shape_cast %101 : vector<4x288xf32> to vector<1x4x288xf32>
    tpu.vector_store %arg9[%c0_44, %c0_45, %c0_46], %104 {strides = array<i32>} : memref<1x4x288xf32, #tpu.memory_space<vmem>>, vector<1x4x288xf32>,
    return
  }
  func.func @transform_0(%arg0: i32) -> (i32, i32, i32) {
    %c0_i32 = arith.constant 0 : i32
    %c0_i32_0 = arith.constant 0 : i32
    %c0_i32_1 = arith.constant 0 : i32
    return %arg0, %c0_i32, %c0_i32_0 : i32, i32, i32
  }
  func.func @transform_1(%arg0: i32) -> (i32, i32) {
    %c0_i32 = arith.constant 0 : i32
    %c0_i32_0 = arith.constant 0 : i32
    %c0_i32_1 = arith.constant 0 : i32
    return %c0_i32, %c0_i32_0 : i32, i32
  }
  func.func @transform_2(%arg0: i32) -> (i32, i32, i32) {
    %c0_i32 = arith.constant 0 : i32
    %c0_i32_0 = arith.constant 0 : i32
    %c0_i32_1 = arith.constant 0 : i32
    %c0_i32_2 = arith.constant 0 : i32
    return %c0_i32, %c0_i32_0, %c0_i32_1 : i32, i32, i32
  }
  func.func @transform_3(%arg0: i32) -> (i32, i32) {
    %c0_i32 = arith.constant 0 : i32
    %c0_i32_0 = arith.constant 0 : i32
    %c0_i32_1 = arith.constant 0 : i32
    return %c0_i32, %c0_i32_0 : i32, i32
  }
  func.func @transform_4(%arg0: i32) -> (i32, i32) {
    %c0_i32 = arith.constant 0 : i32
    %c0_i32_0 = arith.constant 0 : i32
    %c0_i32_1 = arith.constant 0 : i32
    return %c0_i32, %c0_i32_0 : i32, i32
  }
  func.func @transform_5(%arg0: i32) -> (i32, i32, i32) {
    %c0_i32 = arith.constant 0 : i32
    %c0_i32_0 = arith.constant 0 : i32
    %c0_i32_1 = arith.constant 0 : i32
    %c0_i32_2 = arith.constant 0 : i32
    return %c0_i32, %c0_i32_0, %c0_i32_1 : i32, i32, i32
  }
  func.func @transform_6(%arg0: i32) -> (i32, i32) {
    %c0_i32 = arith.constant 0 : i32
    %c0_i32_0 = arith.constant 0 : i32
    %c0_i32_1 = arith.constant 0 : i32
    return %c0_i32, %c0_i32_0 : i32, i32
  }
  func.func @transform_7(%arg0: i32) -> (i32, i32) {
    %c0_i32 = arith.constant 0 : i32
    %c0_i32_0 = arith.constant 0 : i32
    %c0_i32_1 = arith.constant 0 : i32
    return %c0_i32, %c0_i32_0 : i32, i32
  }
  func.func @transform_8(%arg0: i32) -> (i32, i32, i32) {
    %c0_i32 = arith.constant 0 : i32
    %c0_i32_0 = arith.constant 0 : i32
    %c0_i32_1 = arith.constant 0 : i32
    return %arg0, %c0_i32, %c0_i32_0 : i32, i32, i32
  }
}

</mosaic_0001>

<bundles_post_ra>
// kernel: tpu_custom_call.1
= control target key start
LH: loop header
LB: loop body
LE: loop exit
PB: predicated region body
PF: predicated region fallthrough
CT: control target
= control target key end

     0   :  { %13 = vsyncpa [#allocation4], 0  ;;  %s1979_s0 = inlined_call_operand.hbm [shape: f32[2,4,326], index: 0, kind: input, shape index: {}]   ;;  %s1980_s1 = inlined_call_operand.vmem [shape: s32[1,288], index: 1, kind: input, shape index: {}]   ;;  %s1981_s2 = inlined_call_operand.vmem [shape: bf16[3,4,12], index: 2, kind: input, shape index: {}]   ;;  %s1982_s3 = inlined_call_operand.vmem [shape: f32[4,1], index: 3, kind: input, shape index: {}]   ;;  %s1983_s4 = inlined_call_operand.vmem [shape: f32[4,1], index: 4, kind: input, shape index: {}]   ;;  %s1984_s5 = inlined_call_operand.vmem [shape: bf16[3,4,12], index: 5, kind: input, shape index: {}]   ;;  %s1985_s6 = inlined_call_operand.vmem [shape: f32[4,1], index: 6, kind: input, shape index: {}]   ;;  %s1986_s7 = inlined_call_operand.vmem [shape: f32[4,1], index: 7, kind: input, shape index: {}]   ;;  %s1987_s8 = inlined_call_operand.hbm [shape: f32[2,4,288], index: 8, kind: output, shape index: {}]  }
   0x1   :  { %15 = vsyncpa [#allocation4 + $0x1], 0 }
   0x2   :  { %16 = vsyncpa [#allocation5], 0 }
   0x3   :  { %18 = vsyncpa [#allocation5 + $0x1], 0  ;;  %s1648_s27 = smov 0   ;;  %s1650_s28 = smov 0  }
   0x4   :  { %s1652_s29 = smov 0   ;;  %s1654_s30 = smov 0  }
   0x5 LB: > { %s1669_s9 = sadd.s32 4294967295, %s1586_s30   ;;  %s1289_s10 = sadd.s32 4294967294, %s1586_s30   ;;  %s1586_s30 = sphi %s1654_s30, %s2006_s30   ;;  %s1582_s29 = sphi %s1652_s29, %s2005_s29   ;;  %s1578_s28 = sphi %s1650_s28, %s2004_s28   ;;  %s1574_s27 = sphi %s1648_s27, %s2003_s27  }
   0x6   : > { %s1673_s11 = sadd.s32 1, %s1586_s30   ;;  %s31_s12 = sadd.s32 1, %s1582_s29 }
   0x7   : > { %s28_s13 = ssub.s32 %s1586_s30, %s1673_s11  ;;  %p38_p0 = scmp.ne.s32.totalorder %s1582_s29, %s1578_s28 }
   0x8   : > { %p29_p1 = scmp.eq.s32.totalorder %s28_s13, 0  ;;  %p39_p2 = scmp.eq.s32.totalorder %s1586_s30, 0 }
   0x9   : > { %p44_p3 = scmp.ne.s32.totalorder %s1578_s28, %s1574_s27  ;;  %p45_p4 = scmp.eq.s32.totalorder %s1669_s9, 0 }
   0xa   : > { %s1685_s14 = scalar_select %p29_p1, %s1582_s29, %s31_s12  }
   0xb   : > { %p40_p5 = por %p39_p2, %p38_p0  ;;  %p1687_p6 = por %p45_p4, %p44_p3 }
   0xc   : > { %1991 = sst [smem:[#allocation9_spill]] %s1685_s14  ;;  %p215_p7 = scmp.eq.s32.totalorder %s1669_s9, 1 }
   0xd   : > { %p221_p8 = scmp.eq.s32.totalorder %s1289_s10, 1  ;;  %p1415_p10 = scmp.lt.s32.totalorder %s1586_s30, 2 }
   0xe   : > { %p1694_p11 = por %p215_p7, %p38_p0  ;;  %s262_s18 = sand.u32 1, %s1582_s29  }
   0xf   : > { %p1698_p12 = por %p221_p8, %p44_p3  ;;  %s1400_s19 = smul.u32 192, %s1586_s30 }
  0x10   : > { %s1993_s16 = scalar_select %p1694_p11, 1, 0 }
  0x11   : > { %s1994_s17 = scalar_select %p1698_p12, 1, 0 }
  0x12   : > { %s1399_s20 = smul.u32 12, %s262_s18  ;;  %s1707_s23 = scalar_lea.hbm %s1979_s0, %s1400_s19 }
  0x13   : > { %p1709_p13 = pnand %p1415_p10, %p40_p5  ;;  %s263_s10 = scalar_lea.sflag [#allocation4], %s262_s18 }
  0x14   : > { %s266_s25 = scalar_lea.vmem [#allocation3], %s1399_s20  ;;  %s1490_s12 = scalar_lea.hbm %s1707_s23, 192 }
  0x15   : > { %s274_s26 = sshll.u32 %s266_s25, 4  ;;  %p1491_p2 = scmp.ne.s32.totalorder %s1707_s23, %s1490_s12  ;;  %s1714_s26 = int_to_ptr.vmem [resolvable:$true] %s274_s26 }
  0x16   : > { %p1492_p3 = pneg %p1709_p13  ;;  %s1495_s21 = scalar_lea.hbm %s1979_s0, 384 }
  0x17   : > { %p1496_p7 = scmp.lt.u32.totalorder %s1707_s23, %s1979_s0  ;;  %p1497_p8 = scmp.lt.u32.totalorder %s1495_s21, %s1490_s12 }
  0x18   : > { %p1493_p4 = pnand %p1492_p3, %p1491_p2  ;;  %p1499_p9 = scmp.lt.u32.totalorder %s1490_s12, %s1707_s23 }
  0x19   : > { %p1498_p10 = por %p1497_p8, %p1496_p7 }
  0x1a   : > { %p1494_p5 = pneg %p1493_p4 }
  0x1b   : > { %p1500_p0 = por %p1499_p9, %p1498_p10 }
  0x1d   : > { %p1501_p1 = pnand %p1500_p0, %p1494_p5 }
  0x1f   : > { %1504 = shalt.err (!%p1501_p1)
}
  0x20   : > { %s1505_s18 = scalar_lea.vmem %s1714_s26, 192  ;;  %s1588_s20 = smov [#allocation3]  }
  0x21   : > { %p1506_p2 = scmp.ne.s32.totalorder %s1714_s26, %s1505_s18  ;;  %s1510_s25 = sshll.u32 %s1588_s20, 4  ;;  %s1511_s25 = int_to_ptr.vmem [resolvable:$false] %s1510_s25 }
  0x22   : > { %s1512_s14 = scalar_lea.vmem %s1511_s25, 384  ;;  %p1513_p11 = scmp.lt.s32.totalorder %s1714_s26, %s1511_s25 }
  0x23   : > { %p1508_p4 = pnand %p1506_p2, %p1492_p3  ;;  %p1514_p7 = scmp.lt.s32.totalorder %s1512_s14, %s1505_s18 }
  0x25   : > { %p1509_p12 = pneg %p1508_p4  ;;  %p1515_p8 = por %p1514_p7, %p1513_p11 }
  0x27   : > { %p1516_p9 = pnand %p1515_p8, %p1509_p12 }
  0x29   : > { %1519 = shalt.err (!%p1516_p9)
}
  0x2a   : > { %1410 = dma.hbm_to_vmem [thread:$0]  (!%p1709_p13), %s1707_s23, 192, %s1714_s26, %s263_s10  }
  0x2b   : > { %p1996_p0 = scmp.lt.s32.totalorder %s1586_s30, 3  ;;  %p1997_p1 = scmp.ge.s32.totalorder %s1586_s30, 1 }
  0x2d   : > { %p280_p3 = pnand %p1997_p1, %p1996_p0 }
  0x2e   : > { %s1747_s12 = sand.u32 (!%p280_p3), 1, %s1578_s28  }
  0x2f   : > { %283 = sbr.rel (%p280_p3) target bundleno = 1559 (0x617), region = 52  ;;  %s286_s19 = scalar_lea.sflag (!%p280_p3), [#allocation4], %s1747_s12 }
  0x30   : > { %s1401_s13 = smul.u32 (!%p280_p3), 12, %s1747_s12 }
  0x32   : > { %s289_s24 = scalar_lea.vmem (!%p280_p3), [#allocation3], %s1401_s13 }
  0x36   : > { %1565 = dma.done.wait (%p1687_p6), %s286_s19, 192  }
  0x37   : > { %1567 = vsyncadd (%p1687_p6), %s286_s19, 4294967104  ;;  %v1757_v0 = vld [vmem:[%s289_s24] sm:$0xff]  ;;  %v1763_v3 = vld [vmem:[%s289_s24 + $0x8] sm:$0xf]  ;;  %s1589_s23 = smov 127   ;;  %s1590_s26 = smov 126  }
  0x38   : > { %v330_v1 = vcombine.low %v1757_v0, %v1757_v0  ;;  %v328_v2 = vcombine.high %v1757_v0, %v1757_v0  ;;  %v331_v6 = vcombine.low %v1763_v3, %v1763_v3  ;;  %v1591_v7 = vmov 0.0   ;;  %s1594_s15 = smov 110   ;;  %s1595_s10 = smov 92   ;;  %v673_v27 = vld [vmem:[%s1982_s3] sm:$0xf] }
  0x39   : > { %1331 = vmatprep.subr.bf16.mxu1 %v1591_v7  ;;  %vm338_vm0 = vcmask 1039360   ;;  %vm356_vm1 = vcmask 1043456   ;;  %vm350_vm2 = vcmask 1031168   ;;  %vm1989_vm3 = vmmov 0   ;;  %v682_v28 = vld [vmem:[%s1983_s4] sm:$0xf] }
  0x3a   : > { %v1462_v4 = vpack.i.bf16 %v1757_v0, %v330_v1  ;;  %v1467_v5 = vpack.i.bf16 %v328_v2, %v1757_v0  ;;  %1333 = vmatprep.mubr.msk.bf16.mxu1 %vm1989_vm3, %v1591_v7  ;;  %v1593_v16 = vmov 0   ;;  %vm375_vm4 = vcmask 900096   ;;  %v1294_v37 = vld [vmem:[%s1981_s2 + $0x2] sm:$0x3]  ;;  %v363_v43 = vld [vmem:[%s1981_s2] sm:$0x3] }
  0x3b   : > { %424 = vmatprep.mubr.bf16.mxu0 %v1593_v16  ;;  %1472 = vset.pattern.permute.xlu0 %v1593_v16  ;;  %vm382_vm5 = vcmask 1045504   ;;  %vm378_vm6 = vcmask 97280   ;;  %vm574_vm7 = vcmask 752640   ;;  %v1301_v47 = vld [vmem:[%s1981_s2 + $0x4] sm:$0x3]  ;;  %s1596_s18 = smov 1  }
  0x3c   : > { %1463 = vrot.lane.b32.xlu0 %v1462_v4, %s1589_s23  ;;  %1468 = vrot.lane.b32.xlu1 %v1467_v5, %s1590_s26  ;;  %s1597_s20 = smov 3   ;;  %v739_v5 = vlaneseq  ;;  %vm729_vm10 = vcmask 23552   ;;  %vm703_vm11 = vcmask 7168   ;;  %s1598_s19 = smov 18  }
  0x3d   : > { %1473 = vset.pattern.permute.xlu1 %v1593_v16  ;;  %s1599_s24 = smov 54   ;;  %p1999_p11 = scmp.ne.s32.totalorder %s1993_s16, 0 }
  0x40   : > { %336 = vrot.lane.b32.xlu0 %v331_v6, %s1589_s23  ;;  %348 = vrot.lane.b32.xlu1 %v1763_v3, %s1590_s26  ;;  %v325_v6 = vld [vmem:[%s1980_s1] sm:$0x7] }
  0x41   : > { %vm737_vm8 = vcmp.eq.s32.totalorder %v325_v6, 17  ;;  %vm736_vm9 = vcmp.eq.s32.totalorder %v325_v6, 0 }
  0xae   : > { %v1464_v8 = vpop.permute.xlu0 %1463  ;;  %v1469_v9 = vpop.permute.xlu1 %1468 }
  0xaf   : > { %v1466_v10 = vunpack.i.h.bf16 %v1464_v8  ;;  %v1465_v11 = vunpack.i.l.bf16 %v1464_v8  ;;  %v1471_v12 = vunpack.i.h.bf16 %v1469_v9  ;;  %v1470_v13 = vunpack.i.l.bf16 %v1469_v9 }
  0xb0   : > { %v740_v8 = vshrl.u32 %v739_v5, 7 }
  0xb1   : > { %v339_v14 = vsel %vm338_vm0, %v1465_v11, %v1466_v10  ;;  %v351_v15 = vsel %vm350_vm2, %v1470_v13, %v1471_v12 }
  0xb2   : > { %v337_v17 = vpop.permute.xlu0 %336  ;;  %v349_v18 = vpop.permute.xlu1 %348  ;;  %v357_v19 = vsel %vm356_vm1, %v1757_v0, %v339_v14  ;;  %v741_v11 = vsub.s32 0, %v740_v8  ;;  %v745_v13 = vsub.s32 1, %v740_v8 }
  0xb3   : > { %v340_v20 = vsel %vm338_vm0, %v1466_v10, %v337_v17  ;;  %v359_v21 = vsel %vm356_vm1, %v1763_v3, %v337_v17  ;;  %v352_v22 = vsel %vm350_vm2, %v1471_v12, %v349_v18  ;;  %v360_v23 = vpack.c.bf16 %v351_v15, %v357_v19 }
  0xb4   : > { %v358_v24 = vsel %vm356_vm1, %v328_v2, %v340_v20  ;;  %v362_v26 = vpack.c.bf16 %v349_v18, %v359_v21  ;;  %v738_v12 = vsel %vm737_vm8, 1, %v1593_v16  ;;  %v757_v15 = vsel %vm736_vm9, 1, %v1593_v16 }
  0xb5   : > { %v361_v25 = vpack.c.bf16 %v352_v22, %v358_v24  ;;  %369 = vrot.lane.b32.xlu0 %v360_v23, %s1594_s15  ;;  %v477_v41 = vsel %vm382_vm5, %v360_v23, 0  ;;  %v742_v18 = vrot.slane %v738_v12, %v741_v11  ;;  %v746_v19 = vrot.slane %v738_v12, %v745_v13 }
  0xb6   : > { %v483_v38 = vsel %vm382_vm5, %v362_v26, 0  ;;  %v761_v20 = vrot.slane %v757_v15, %v741_v11  ;;  %v749_v21 = vsub.s32 2, %v740_v8  ;;  %vm721_vm8 = vcmask 252928  }
  0xb7   : > { %371 = vrot.lane.b32.xlu1 %v361_v25, %s1594_s15  ;;  %vm751_vm12 = vcmp.eq.s32.totalorder %v742_v18, 1  ;;  %vm752_vm13 = vcmp.eq.s32.totalorder %v746_v19, 1 }
  0xb8   : > { %vm770_vm14 = vcmp.eq.s32.totalorder %v761_v20, 1 }
  0xb9   : > { %373 = vrot.lane.b32.xlu0 %v362_v26, %s1594_s15 }
  0xbb   : > { %568 = vrot.lane.b32.xlu1 %v360_v23, %s1595_s10  ;;  %v765_v23 = vrot.slane %v757_v15, %v745_v13 }
  0xbd   : > { %570 = vrot.lane.b32.xlu0 %v361_v25, %s1595_s10  ;;  %vm771_vm15 = vcmp.eq.s32.totalorder %v765_v23, 1 }
  0xbf   : > { %572 = vrot.lane.b32.xlu1 %v362_v26, %s1595_s10 }
  0xc1   : > { %676 = vperm.xlu0 %1472, %v673_v27   ;;  %v750_v27 = vrot.slane %v738_v12, %v749_v21 }
  0xc3   : > { %685 = vperm.xlu1 %1473, %v682_v28   ;;  %vm753_vm9 = vcmp.eq.s32.totalorder %v750_v27, 1 }
 0x127   : > { %v370_v29 = vpop.permute.xlu0 %369 }
 0x129   : > { %v372_v30 = vpop.permute.xlu1 %371 }
 0x12a   : > { %v376_v31 = vsel %vm375_vm4, %v370_v29, %v372_v30 }
 0x12b   : > { %v374_v32 = vpop.permute.xlu0 %373  ;;  %v384_v36 = vsel %vm382_vm5, %v376_v31, 0 }
 0x12c   : > { %v377_v33 = vsel %vm375_vm4, %v372_v30, %v374_v32  ;;  %v390_v34 = vsel %vm382_vm5, %v374_v32, 0  ;;  %v769_v30 = vrot.slane %v757_v15, %v749_v21  ;;  %v1154_v21 = vld [vmem:[%s1985_s6] sm:$0xf] }
 0x12d   : > { %1295 = vmatprep.subr.msk.bf16.mxu0 %vm382_vm5, %v377_v33  ;;  %1332 = vmatpush3.bf16.msra.mxu1 %v390_v34  ;;  %v569_v35 = vpop.permute.xlu1 %568 }
 0x12e   : > { %393 = vmatpush1.bf16.msra.mxu0 %v384_v36  ;;  %1337 = vmatprep.subr.bf16.mxu1 %v1591_v7 }
 0x12f   : > { %1298 = vmatprep.subr.msk.bf16.mxu0 %vm382_vm5, %v361_v25  ;;  %v571_v39 = vpop.permute.xlu0 %570 }
 0x130   : > { %1334 = vmatmul.mubr.msk.bf16.vlgmr.msra.gmra.mrb[0].mxu1 %vm378_vm6, %v1294_v37  ;;  %v575_v44 = vsel %vm574_vm7, %v569_v35, %v571_v39 }
 0x131   : > { %1296 = vmatmul.mubr.msk.bf16.vlgmr.msra.gmra.mrb[0].mxu0 %vm378_vm6, %v1294_v37  ;;  %1338 = vmatpush3.bf16.msra.mxu1 %v483_v38  ;;  %v573_v40 = vpop.permute.xlu1 %572  ;;  %v581_v46 = vsel %vm382_vm5, %v575_v44, 0 }
 0x132   : > { %v576_v42 = vsel %vm574_vm7, %v571_v39, %v573_v40  ;;  %486 = vmatpush1.bf16.msra.mxu0 %v477_v41  ;;  %1339 = vmatprep.mubr.msk.bf16.mxu1 %vm1989_vm3, %v1591_v7  ;;  %v587_v45 = vsel %vm382_vm5, %v573_v40, 0 }
 0x133   : > { %1302 = vmatprep.subr.msk.bf16.mxu0 %vm382_vm5, %v576_v42  ;;  %1343 = vmatprep.subr.bf16.mxu1 %v1591_v7 }
 0x134   : > { %517 = vmatprep.mubr.bf16.mxu0 %v1593_v16 }
 0x13c   : > { %1340 = vmatmul.mubr.msk.bf16.vlgmr.msra.gmra.mrb[0].mxu1 %vm378_vm6, %v363_v43 }
 0x13d   : > { %1344 = vmatpush3.bf16.msra.mxu1 %v587_v45  ;;  %1299 = vmatmul.mubr.msk.bf16.vlgmr.msra.gmra.mrb[0].mxu0 %vm378_vm6, %v363_v43 }
 0x13e   : > { %590 = vmatpush1.bf16.msra.mxu0 %v581_v46  ;;  %1345 = vmatprep.mubr.msk.bf16.mxu1 %vm1989_vm3, %v1591_v7 }
 0x13f   : > { %621 = vmatprep.mubr.bf16.mxu0 %v1593_v16  ;;  %1349 = vmatprep.subr.bf16.mxu1 %v1591_v7 }
 0x140   : > { %v677_v48 = vpop.permute.xlu0 %676 }
 0x142   : > { %v686_v50 = vpop.permute.xlu1 %685 }
 0x148   : > { %1346 = vmatmul.mubr.msk.bf16.vlgmr.msra.gmra.mrb[0].mxu1 %vm378_vm6, %v1301_v47 }
 0x149   : > { %1303 = vmatmul.mubr.msk.bf16.vlgmr.msra.gmra.mrb[0].mxu0 %vm378_vm6, %v1301_v47  ;;  %1351 = vmatprep.mubr.msk.bf16.mxu1 %vm1989_vm3, %v1591_v7  ;;  %vm772_vm3 = vcmp.eq.s32.totalorder %v769_v30, 1 }
 0x14a   : > { %906 = vmatprep.mubr.bf16.mxu0 %v1593_v16 }
 0x21b   : > { %v664_v49 = vpop.f32.mrb[0].mxu1 }
 0x21c   : > { %v681_v51 = vmul.f32 %v677_v48, %v664_v49  ;;  %v623_v52 = vpop.f32.mrb[0].mxu0  ;;  %v1347_v53 = vpop.f32.mrb[1].mxu1 }
 0x21d   : > { %v679_v54 = vmul.f32 %v677_v48, %v623_v52  ;;  %v625_v55 = vpop.f32.mrb[1].mxu0  ;;  %v667_v56 = vpop.f32.mrb[2].mxu1 }
 0x21e   : > { %v680_v57 = vmul.f32 %v677_v48, %v625_v55  ;;  %v690_v58 = vadd.f32 %v686_v50, %v681_v51  ;;  %v627_v59 = vpop.f32.mrb[2].mxu0  ;;  %v1348_v60 = vpop.f32.mrb[3].mxu1 }
 0x21f   : > { %v688_v61 = vadd.f32 %v686_v50, %v679_v54  ;;  %v628_v62 = vpop.f32.mrb[3].mxu0 }
 0x220   : > { %v1841_v63 = vmax.f32 %v690_v58, 0.0  ;;  %v689_v1 = vadd.f32 %v686_v50, %v680_v57 }
 0x221   : > { %v691_v2 = vmax.f32 %v688_v61, 0.0 }
 0x222   : > { %701 = vrot.lane.b32.xlu1 %v1841_v63, %s1596_s18  ;;  %v692_v4 = vmax.f32 %v689_v1, 0.0 }
 0x223   : > { %710 = vrot.lane.b32.xlu0 %v691_v2, %s1589_s23 }
 0x226   : > { %697 = vrot.lane.b32.xlu1 %v691_v2, %s1596_s18 }
 0x227   : > { %699 = vrot.lane.b32.xlu0 %v692_v4, %s1596_s18  ;;  %s1602_s18 = smov [#allocation6]  }
 0x22a   : > { %723 = vrot.lane.b32.xlu1 %v691_v2, %s1597_s20 }
 0x22b   : > { %725 = vrot.lane.b32.xlu0 %v692_v4, %s1597_s20 }
 0x22e   : > { %712 = vrot.lane.b32.xlu1 %v692_v4, %s1589_s23 }
 0x22f   : > { %714 = vrot.lane.b32.xlu0 %v1841_v63, %s1589_s23 }
 0x232   : > { %727 = vrot.lane.b32.xlu1 %v1841_v63, %s1597_s20  ;;  %s1524_s20 = sshll.u32 %s1602_s18, 4  ;;  %s1525_s20 = int_to_ptr.vmem [resolvable:$false] %s1524_s20 }
 0x233   : > { %s1526_s25 = scalar_lea.vmem %s1525_s20, 384 }
 0x294   : > { %v702_v9 = vpop.permute.xlu1 %701 }
 0x295   : > { %v711_v10 = vpop.permute.xlu0 %710 }
 0x298   : > { %v698_v14 = vpop.permute.xlu1 %697 }
 0x299   : > { %v700_v17 = vpop.permute.xlu0 %699  ;;  %v709_v28 = vsel %vm703_vm11, %v691_v2, %v698_v14 }
 0x29a   : > { %v704_v31 = vsel %vm703_vm11, %v698_v14, %v700_v17  ;;  %v705_v41 = vsel %vm703_vm11, %v700_v17, %v702_v9  ;;  %vm805_vm11 = vcmask 441344  }
 0x29c   : > { %v724_v22 = vpop.permute.xlu1 %723 }
 0x29d   : > { %v726_v24 = vpop.permute.xlu0 %725  ;;  %v735_v25 = vsel %vm729_vm10, %v691_v2, %v724_v22 }
 0x29e   : > { %v730_v26 = vsel %vm729_vm10, %v724_v22, %v726_v24  ;;  %v754_v32 = vsel %vm751_vm12, %v735_v25, %v709_v28  ;;  %vm799_vm12 = vcmask 404480   ;;  %v1163_v22 = vld [vmem:[%s1986_s7] sm:$0xf] }
 0x29f   : > { %v755_v35 = vsel %vm752_vm13, %v730_v26, %v704_v31  ;;  %vm790_vm13 = vcmask 146432   ;;  %v1305_v31 = vld [vmem:[%s1984_s5 + $0x2] sm:$0x3] }
 0x2a0   : > { %v713_v29 = vpop.permute.xlu1 %712 }
 0x2a1   : > { %v716_v33 = vsel %vm338_vm0, %v711_v10, %v713_v29  ;;  %v715_v34 = vpop.permute.xlu0 %714 }
 0x2a2   : > { %v773_v36 = vsel %vm770_vm14, %v716_v33, %v754_v32  ;;  %v717_v37 = vsel %vm338_vm0, %v713_v29, %v715_v34  ;;  %v722_v43 = vsel %vm721_vm8, %v715_v34, %v1841_v63  ;;  %vm796_vm14 = vcmask 1047556  }
 0x2a3   : > { %v774_v38 = vsel %vm771_vm15, %v717_v37, %v755_v35  ;;  %vm808_vm15 = vcmask 552336   ;;  %vm780_vm8 = vcmask 142336   ;;  %v848_v37 = vld [vmem:[%s1984_s5] sm:$0x3] }
 0x2a4   : > { %v728_v39 = vpop.permute.xlu1 %727  ;;  %v784_v40 = vcombine.low %v773_v36, %v774_v38 }
 0x2a5   : > { %v731_v42 = vsel %vm729_vm10, %v726_v24, %v728_v39  ;;  %vm795_vm10 = vcmask 1043600  }
 0x2a6   : > { %785 = vrot.lane.b32.xlu0 %v784_v40, %s1598_s19  ;;  %v756_v44 = vsel %vm753_vm9, %v731_v42, %v705_v41  ;;  %vm797_vm9 = vmor %vm796_vm14, %vm795_vm10  ;;  %v1312_v41 = vld [vmem:[%s1984_s5 + $0x4] sm:$0x3] }
 0x2a7   : > { %v775_v45 = vsel %vm772_vm3, %v722_v43, %v756_v44  ;;  %vm810_vm3 = vcmask 568864  }
 0x2a8   : > { %v801_v46 = vcombine.low %v774_v38, %v775_v45 }
 0x2aa   : > { %787 = vrot.lane.b32.xlu0 %v775_v45, %s1598_s19  ;;  %802 = vrot.lane.b32.xlu1 %v801_v46, %s1599_s24  ;;  %s1600_s19 = smov 19   ;;  %s1601_s24 = smov 109  }
 0x2ae   : > { %777 = vrot.lane.b32.xlu1 %v773_v36, %s1594_s15 }
 0x318   : > { %v786_v47 = vpop.permute.xlu0 %785 }
 0x319   : > { %v789_v48 = vrot.slane %v786_v47, 4 }
 0x31b   : > { %v791_v55 = vsel %vm790_vm13, %v789_v48, %v786_v47 }
 0x31c   : > { %v788_v49 = vpop.permute.xlu0 %787  ;;  %v803_v50 = vpop.permute.xlu1 %802 }
 0x31d   : > { %v792_v51 = vsel %vm790_vm13, %v789_v48, %v788_v49  ;;  %v804_v52 = vrot.slane %v803_v50, 4 }
 0x31e   : > { %800 = vst.msk [vmem:[#allocation2 + $0x8] sm:$0xf] %vm799_vm12, %v792_v51 }
 0x31f   : > { %v806_v53 = vsel %vm805_vm11, %v803_v50, %v804_v52 }
 0x320   : > { %809 = vst.msk [vmem:[#allocation2 + $0x8] sm:$0xf] %vm808_vm15, %v806_v53  ;;  %v778_v54 = vpop.permute.xlu1 %777 }
 0x321   : > { %811 = vst.msk [vmem:[#allocation2 + $0x8] sm:$0xf] %vm810_vm3, %v1591_v7 }
 0x322   : > { %781 = vst.msk [vmem:[#allocation2] sm:$0xf] %vm780_vm8, %v778_v54 }
 0x323   : > { %798 = vst.msk [vmem:[#allocation2] sm:$0xff] %vm797_vm9, %v791_v55 }
 0x328   : > { %v813_v56 = vld [vmem:[#allocation2 + $0x8] sm:$0xf] }
 0x329   : > { %v819_v58 = vcombine.low %v813_v56, %v813_v56 }
 0x32a   : > { %v812_v57 = vld [vmem:[#allocation2] sm:$0xff] }
 0x32b   : > { %v818_v59 = vcombine.low %v812_v57, %v812_v57  ;;  %824 = vrot.lane.b32.xlu1 %v819_v58, %s1589_s23  ;;  %v816_v61 = vcombine.high %v812_v57, %v812_v57 }
 0x32d   : > { %v1474_v60 = vpack.i.bf16 %v812_v57, %v818_v59  ;;  %v1479_v62 = vpack.i.bf16 %v816_v61, %v812_v57 }
 0x32f   : > { %1475 = vrot.lane.b32.xlu0 %v1474_v60, %s1589_s23  ;;  %835 = vrot.lane.b32.xlu1 %v813_v56, %s1590_s26  ;;  %s1402_s23 = smul.u32 192, %s1669_s9  ;;  %s1205_s9 = scalar_lea.sflag [#allocation5], %s1747_s12 }
 0x333   : > { %1480 = vrot.lane.b32.xlu0 %v1479_v62, %s1590_s26  ;;  %s321_s26 = scalar_lea.vmem [#allocation6], %s1401_s13 }
 0x334   : > { %s1219_s21 = sshll.u32 %s321_s26, 4  ;;  %s1937_s21 = int_to_ptr.vmem [resolvable:$true] %s1219_s21 }
 0x335   : > { %s1520_s13 = scalar_lea.vmem %s1937_s21, 192  ;;  %p1527_p5 = scmp.lt.s32.totalorder %s1937_s21, %s1525_s20 }
 0x336   : > { %p1521_p6 = scmp.ne.s32.totalorder %s1937_s21, %s1520_s13  ;;  %p1528_p10 = scmp.lt.s32.totalorder %s1526_s25, %s1520_s13 }
 0x338   : > { %p1522_p12 = pnand %p1521_p6, %p1999_p11  ;;  %p1529_p2 = por %p1528_p10, %p1527_p5 }
 0x33a   : > { %p1523_p13 = pneg %p1522_p12 }
 0x33c   : > { %p1530_p4 = pnand %p1529_p2, %p1523_p13 }
 0x39d   : > { %v825_v63 = vpop.permute.xlu1 %824 }
 0x39e   : > { %v844_v19 = vsel %vm356_vm1, %v813_v56, %v825_v63 }
 0x3a1   : > { %v1476_v1 = vpop.permute.xlu0 %1475  ;;  %v836_v9 = vpop.permute.xlu1 %835 }
 0x3a2   : > { %v1478_v2 = vunpack.i.h.bf16 %v1476_v1  ;;  %v1477_v4 = vunpack.i.l.bf16 %v1476_v1  ;;  %v847_v20 = vpack.c.bf16 %v836_v9, %v844_v19 }
 0x3a4   : > { %v826_v5 = vsel %vm338_vm0, %v1477_v4, %v1478_v2  ;;  %v827_v6 = vsel %vm338_vm0, %v1478_v2, %v825_v63  ;;  %v965_v34 = vsel %vm382_vm5, %v847_v20, 0  ;;  %vm1998_vm0 = vmmov 0  }
 0x3a5   : > { %v1481_v8 = vpop.permute.xlu0 %1480  ;;  %v843_v12 = vsel %vm356_vm1, %v816_v61, %v827_v6  ;;  %v842_v15 = vsel %vm356_vm1, %v812_v57, %v826_v5 }
 0x3a6   : > { %v1483_v10 = vunpack.i.h.bf16 %v1481_v8  ;;  %v1482_v11 = vunpack.i.l.bf16 %v1481_v8 }
 0x3a8   : > { %v838_v13 = vsel %vm350_vm2, %v1483_v10, %v836_v9  ;;  %v837_v14 = vsel %vm350_vm2, %v1482_v11, %v1483_v10  ;;  %vm1181_vm2 = vcmask 154624  }
 0x3a9   : > { %v846_v17 = vpack.c.bf16 %v838_v13, %v843_v12  ;;  %v845_v18 = vpack.c.bf16 %v837_v14, %v842_v15 }
 0x3ab   : > { %854 = vrot.lane.b32.xlu0 %v845_v18, %s1594_s15  ;;  %856 = vrot.lane.b32.xlu1 %v846_v17, %s1594_s15  ;;  %v959_v35 = vsel %vm382_vm5, %v845_v18, 0 }
 0x3af   : > { %858 = vrot.lane.b32.xlu0 %v847_v20, %s1594_s15  ;;  %1050 = vrot.lane.b32.xlu1 %v845_v18, %s1595_s10 }
 0x3b3   : > { %1052 = vrot.lane.b32.xlu0 %v846_v17, %s1595_s10  ;;  %1054 = vrot.lane.b32.xlu1 %v847_v20, %s1595_s10  ;;  %s1935_s10 = scalar_lea.hbm %s1987_s8, %s1402_s23 }
 0x3b7   : > { %1157 = vperm.xlu0 %1472, %v1154_v21   ;;  %1166 = vperm.xlu1 %1473, %v1163_v22  }
 0x41d   : > { %v855_v23 = vpop.permute.xlu0 %854  ;;  %v857_v24 = vpop.permute.xlu1 %856 }
 0x41e   : > { %v860_v25 = vsel %vm375_vm4, %v855_v23, %v857_v24 }
 0x41f   : > { %v866_v30 = vsel %vm382_vm5, %v860_v25, 0 }
 0x421   : > { %v859_v26 = vpop.permute.xlu0 %858  ;;  %v1051_v27 = vpop.permute.xlu1 %1050 }
 0x422   : > { %v861_v28 = vsel %vm375_vm4, %v857_v24, %v859_v26  ;;  %v872_v29 = vsel %vm382_vm5, %v859_v26, 0  ;;  %vm1202_vm4 = vcmask 257024  }
 0x423   : > { %1306 = vmatprep.subr.msk.bf16.mxu0 %vm382_vm5, %v861_v28  ;;  %1350 = vmatpush3.bf16.msra.mxu1 %v872_v29 }
 0x424   : > { %875 = vmatpush1.bf16.msra.mxu0 %v866_v30  ;;  %1355 = vmatprep.subr.bf16.mxu1 %v1591_v7 }
 0x425   : > { %v1053_v32 = vpop.permute.xlu0 %1052  ;;  %1309 = vmatprep.subr.msk.bf16.mxu0 %vm382_vm5, %v846_v17  ;;  %v1055_v33 = vpop.permute.xlu1 %1054 }
 0x426   : > { %1352 = vmatmul.mubr.msk.bf16.vlgmr.msra.gmra.mrb[4].mxu1 %vm378_vm6, %v1305_v31  ;;  %v1057_v36 = vsel %vm574_vm7, %v1053_v32, %v1055_v33  ;;  %v1056_v38 = vsel %vm574_vm7, %v1051_v27, %v1053_v32  ;;  %v1068_v39 = vsel %vm382_vm5, %v1055_v33, 0 }
 0x427   : > { %1307 = vmatmul.mubr.msk.bf16.vlgmr.msra.gmra.mrb[4].mxu0 %vm378_vm6, %v1305_v31  ;;  %1356 = vmatpush3.bf16.msra.mxu1 %v965_v34  ;;  %v1062_v40 = vsel %vm382_vm5, %v1056_v38, 0 }
 0x428   : > { %968 = vmatpush1.bf16.msra.mxu0 %v959_v35  ;;  %1357 = vmatprep.mubr.msk.bf16.mxu1 %vm1998_vm0, %v1591_v7 }
 0x429   : > { %1313 = vmatprep.subr.msk.bf16.mxu0 %vm382_vm5, %v1057_v36  ;;  %1361 = vmatprep.subr.bf16.mxu1 %v1591_v7  ;;  %vm1197_vm5 = vcmask 891904  }
 0x42a   : > { %999 = vmatprep.mubr.bf16.mxu0 %v1593_v16 }
 0x432   : > { %1358 = vmatmul.mubr.msk.bf16.vlgmr.msra.gmra.mrb[4].mxu1 %vm378_vm6, %v848_v37 }
 0x433   : > { %1362 = vmatpush3.bf16.msra.mxu1 %v1068_v39  ;;  %1310 = vmatmul.mubr.msk.bf16.vlgmr.msra.gmra.mrb[4].mxu0 %vm378_vm6, %v848_v37 }
 0x434   : > { %1071 = vmatpush1.bf16.msra.mxu0 %v1062_v40  ;;  %1363 = vmatprep.mubr.msk.bf16.mxu1 %vm1998_vm0, %v1591_v7 }
 0x435   : > { %1102 = vmatprep.mubr.bf16.mxu0 %v1593_v16 }
 0x436   : > { %v1158_v42 = vpop.permute.xlu0 %1157  ;;  %v1167_v43 = vpop.permute.xlu1 %1166 }
 0x43e   : > { %1364 = vmatmul.mubr.msk.bf16.vlgmr.msra.gmra.mrb[4].mxu1 %vm378_vm6, %v1312_v41 }
 0x43f   : > { %1314 = vmatmul.mubr.msk.bf16.vlgmr.msra.gmra.mrb[4].mxu0 %vm378_vm6, %v1312_v41 }
 0x511   : > { %v1145_v44 = vpop.f32.mrb[4].mxu1 }
 0x512   : > { %v1162_v45 = vmul.f32 %v1158_v42, %v1145_v44  ;;  %v1104_v46 = vpop.f32.mrb[4].mxu0  ;;  %v1365_v47 = vpop.f32.mrb[5].mxu1 }
 0x513   : > { %v1160_v48 = vmul.f32 %v1158_v42, %v1104_v46  ;;  %v1106_v49 = vpop.f32.mrb[5].mxu0  ;;  %v1148_v50 = vpop.f32.mrb[6].mxu1 }
 0x514   : > { %v1171_v7 = vadd.f32 %v1167_v43, %v1162_v45  ;;  %v1161_v51 = vmul.f32 %v1158_v42, %v1106_v49  ;;  %v1108_v16 = vpop.f32.mrb[6].mxu0  ;;  %v1366_v52 = vpop.f32.mrb[7].mxu1 }
 0x515   : > { %v1169_v53 = vadd.f32 %v1167_v43, %v1160_v48  ;;  %v1109_v54 = vpop.f32.mrb[7].mxu0 }
 0x516   : > { %v1170_v55 = vadd.f32 %v1167_v43, %v1161_v51  ;;  %1178 = vrot.lane.b32.xlu1 %v1171_v7, %s1600_s19 }
 0x518   : > { %v1175_v56 = vcombine.low %v1169_v53, %v1170_v55 }
 0x51a   : > { %1176 = vrot.lane.b32.xlu0 %v1175_v56, %s1600_s19 }
 0x588   : > { %v1179_v59 = vpop.permute.xlu1 %1178 }
 0x58c   : > { %v1177_v57 = vpop.permute.xlu0 %1176 }
 0x58d   : > { %v1180_v58 = vrot.slane %v1177_v57, 4 }
 0x58f   : > { %v1182_v60 = vsel %vm1181_vm2, %v1180_v58, %v1177_v57  ;;  %v1183_v61 = vsel %vm1181_vm2, %v1180_v58, %v1179_v59 }
 0x590   : > { %v1186_v62 = vadd.f32 %v1182_v60, %v1757_v0  ;;  %v1187_v63 = vadd.f32 %v1183_v61, %v1763_v3 }
 0x592   : > { %1192 = vrot.lane.b32.xlu1 %v1187_v63, %s1601_s24  ;;  %1190 = vrot.lane.b32.xlu0 %v1186_v62, %s1601_s24 }
 0x604   : > { %v1193_v1 = vpop.permute.xlu1 %1192  ;;  %v1191_v2 = vpop.permute.xlu0 %1190 }
 0x605   : > { %v1195_v4 = vrot.slane %v1193_v1, 4  ;;  %1203 = vst.msk [vmem:[%s321_s26 + $0x8] sm:$0xf] %vm1202_vm4, %v1193_v1  ;;  %v1194_v5 = vrot.slane %v1191_v2, 4 }
 0x607   : > { %v1196_v0 = vsel %vm356_vm1, %v1194_v5, %v1195_v4 }
 0x608   : > { %v1198_v3 = vsel %vm1197_vm5, %v1191_v2, %v1196_v0 }
 0x609   : > { %1201 = vst [vmem:[%s321_s26] sm:$0xff] %v1198_v3 }
 0x60a   : > { %1533 = shalt.err (!%p1530_p4)
}
 0x60b   : > { %s1534_s12 = scalar_lea.hbm %s1935_s10, 192  ;;  %s1538_s24 = scalar_lea.hbm %s1987_s8, 384 }
 0x60c   : > { %p1535_p7 = scmp.ne.s32.totalorder %s1935_s10, %s1534_s12  ;;  %p1539_p0 = scmp.lt.u32.totalorder %s1935_s10, %s1987_s8 }
 0x60d   : > { %p1540_p1 = scmp.lt.u32.totalorder %s1538_s24, %s1534_s12  ;;  %p1542_p6 = scmp.lt.u32.totalorder %s1534_s12, %s1935_s10 }
 0x60e   : > { %p1536_p8 = pnand %p1535_p7, %p1999_p11 }
 0x60f   : > { %p1541_p3 = por %p1540_p1, %p1539_p0 }
 0x610   : > { %p1537_p9 = pneg %p1536_p8 }
 0x611   : > { %p1543_p12 = por %p1542_p6, %p1541_p3 }
 0x613   : > { %p1544_p13 = pnand %p1543_p12, %p1537_p9 }
 0x615   : > { %1547 = shalt.err (!%p1544_p13)
}
 0x616   : > { %1405 = dma.vmem_to_hbm [thread:$0]  (%p1999_p11), %s1937_s21, 192, %s1935_s10, %s1205_s9  }
 0x617 PF: > { %s1231_s22 = sand.u32 1, %s1574_s27   ;;  %p2000_p5 = scmp.ne.s32.totalorder %s1994_s17, 0 }
 0x618   : > { %p2001_p10 = scmp.ge.s32.totalorder %s1586_s30, 2  ;;  %s1232_s15 = scalar_lea.sflag [#allocation5], %s1231_s22 }
 0x61a   : > { %p1412_p2 = pnand %p2001_p10, %p2000_p5 }
 0x61c   : > { %1569 = dma.done.wait (!%p1412_p2), %s1232_s15, 192  }
 0x61d   : > { %1571 = vsyncadd (!%p1412_p2), %s1232_s15, 4294967104  ;;  %s2002_s13 = sld [smem:[#allocation9_spill]]  ;;  %p21_p4 = scmp.ge.s32.totalorder %s1673_s11, 4  }
 0x61e   : > { %s2003_s27 = smov %s1578_s28  ;;  %s2004_s28 = smov %s1582_s29 }
 0x61f   : > { %s2006_s30 = smov %s1673_s11  ;;  %23 = sbr.rel (!%p21_p4) target bundleno = 5 (0x5), region = 101 }
 0x623   : > { %s2005_s29 = smov %s2002_s13 }
 0x626   :  { %1237 = vsyncpa [#allocation4], 1 }
 0x627   :  { %1239 = vsyncpa [#allocation4 + $0x1], 1 }
 0x628   :  { %1240 = vsyncpa [#allocation5], 1 }
 0x629   :  { %1242 = vsyncpa [#allocation5 + $0x1], 1 }

</bundles_post_ra>
